<compile_context>
chip_gen: v5e
topology: v5e:2x2
jax: 0.10.0
libtpu: 0.0.40
codegen_flags: <defaults>
</compile_context>

<pallas_src>
import functools

import jax
import jax.numpy as jnp
from jax.experimental import pallas as pl
from jax.experimental.pallas import tpu as pltpu


_ALIGN_PAD = 8  # row halo rounded up to a sublane tile so scratch stores stay aligned


def _apply_act(z, activate, neg_slope):
    if activate == "lrelu":
        return jnp.where(z > 0, z, neg_slope * z)
    if activate == "relu":
        return jnp.maximum(z, 0.0)
    if activate == "tanh":
        return jnp.tanh(z)
    if activate == "sigmoid":
        return 1.0 / (1.0 + jnp.exp(-z))
    # TODO(synk): 'prelu' needs learned per-channel slopes (extra parameters); not implemented.
    raise NotImplementedError(f"activation {activate!r}")


def _residual_block_kernel(x_ref, w1_ref, b1_ref, w2_ref, b2_ref, o_ref, pad_ref,
                           *, N, H, W, C, KH, PH, activate, neg_slope):
    """Fused conv1 + act + conv2 + skip-add + act for the whole batch.

    x_ref:   (N, H, W*C)                 lane-dense NHWC activations
    w*_ref:  (KH*W*C, W*C)               banded block weights (kw shift + W pad folded in)
    b*_ref:  (1, W*C)                    bias tiled along W
    o_ref:   (N, H, W*C)
    pad_ref: (N, H + 2*_ALIGN_PAD, W*C)  VMEM scratch: row-padded activation
    """
    WC = W * C
    off = _ALIGN_PAD - PH  # scratch row read by tap kh=0 for output row h=0

    # Zero the scratch once; only interior rows get overwritten afterwards, so
    # the row halo stays zero for both convolutions.
    pad_ref[...] = jnp.zeros_like(pad_ref)

    x = x_ref[...]                                     # (N, H, WC) f32

    def conv(w_ref, b_ref):
        # KH row-shifted, full-lane slices -> one lane-dense GEMM on the MXU.
        taps = [pad_ref[:, off + kh: off + kh + H, :].reshape(N * H, WC)
                for kh in range(KH)]
        lhs = jnp.concatenate(taps, axis=-1)           # (N*H, KH*WC)
        acc = jnp.dot(lhs, w_ref[...], preferred_element_type=jnp.float32)
        return acc + b_ref[...]                        # (N*H, WC)

    # conv1 + activation
    pad_ref[:, _ALIGN_PAD:_ALIGN_PAD + H, :] = x       # aligned interior store
    y1 = _apply_act(conv(w1_ref, b1_ref), activate, neg_slope)

    # conv2 (reuse the scratch; halo rows are still zero)
    pad_ref[:, _ALIGN_PAD:_ALIGN_PAD + H, :] = y1.reshape(N, H, WC)
    y2 = conv(w2_ref, b2_ref)

    # skip connection + final activation, all on the lane-dense slab
    z = _apply_act(y2 + x.reshape(N * H, WC), activate, neg_slope)
    o_ref[...] = z.reshape(N, H, WC).astype(o_ref.dtype)


def _banded_weight(weight, W, padding):
    """PyTorch OIHW (Co, Ci, KH, KW) -> (KH*W*Ci, W*Co) banded block matrix.

    rhs[kh*W*Ci + w_in*Ci + ci, w_out*Co + co] =
        weight[co, ci, kh, w_in - w_out + padding]  if that kw is in [0, KW), else 0
    so a single GEMM against the lane-folded activation performs the kw shift
    and the W-direction zero padding for free.
    """
    Co, Ci, KH, KW = weight.shape
    wt = jnp.transpose(weight, (2, 3, 1, 0))                              # (KH, KW, Ci, Co)
    kw = jnp.arange(W)[:, None] - jnp.arange(W)[None, :] + padding        # (W_in, W_out)
    valid = (kw >= 0) & (kw < KW)
    band = wt[:, jnp.clip(kw, 0, KW - 1)]                                 # (KH, W_in, W_out, Ci, Co)
    band = band * valid[None, :, :, None, None].astype(weight.dtype)
    band = jnp.transpose(band, (0, 1, 3, 2, 4))                           # (KH, W_in, Ci, W_out, Co)
    return band.reshape(KH * W * Ci, W * Co)


def residual_block_pallas(x_nchw, w1, b1, w2, b2, *, stride=1, padding=1,
                          activate="lrelu", neg_slope=0.2):
    """Forward pass of Residual_Block (NCHW in / NCHW out), matching PyTorch."""
    N, C, H, W = x_nchw.shape
    Co, Ci, KH, KW = w1.shape
    assert C == Ci == Co and w2.shape == w1.shape and b1.shape == b2.shape == (C,)
    # Residual add requires spatially-preserving convs (the module defaults).
    assert stride == 1 and padding == (KH - 1) // 2 == (KW - 1) // 2, \
        "TODO(synk): only the module defaults (stride=1, 'same' padding) are implemented"

    WC = W * C
    # Layout plumbing only (no spatial-pad HBM round trip): NCHW -> (N, H, W*C).
    x2d = jnp.transpose(x_nchw, (0, 2, 3, 1)).reshape(N, H, WC)

    w1_bd = _banded_weight(w1, W, padding)
    w2_bd = _banded_weight(w2, W, padding)
    b1_row = jnp.tile(b1, W).reshape(1, WC)
    b2_row = jnp.tile(b2, W).reshape(1, WC)

    kernel = functools.partial(
        _residual_block_kernel, N=N, H=H, W=W, C=C, KH=KH, PH=padding,
        activate=activate, neg_slope=neg_slope)

    # TODO(synk): for production sizes (large H/W/C) this whole-batch block must
    # become H-row tiles with a 2-row halo plus a second parallel grid axis for
    # the v7x dual TensorCores; at these test shapes everything is a few KiB of
    # VMEM so a single grid step (batch folded into the GEMM M dim) is fastest.
    out2d = pl.pallas_call(
        kernel,
        out_shape=jax.ShapeDtypeStruct((N, H, WC), x_nchw.dtype),
        grid=(1,),
        in_specs=[
            pl.BlockSpec((N, H, WC), lambda i: (0, 0, 0)),
            pl.BlockSpec((KH * WC, WC), lambda i: (0, 0)),
            pl.BlockSpec((1, WC), lambda i: (0, 0)),
            pl.BlockSpec((KH * WC, WC), lambda i: (0, 0)),
            pl.BlockSpec((1, WC), lambda i: (0, 0)),
        ],
        out_specs=pl.BlockSpec((N, H, WC), lambda i: (0, 0, 0)),
        scratch_shapes=[pltpu.VMEM((N, H + 2 * _ALIGN_PAD, WC), jnp.float32)],
        compiler_params=pltpu.CompilerParams(
            dimension_semantics=("arbitrary",)),
    )(x2d, w1_bd, b1_row, w2_bd, b2_row)

    return jnp.transpose(out2d.reshape(N, H, W, C), (0, 3, 1, 2))


def _reference(x, w1, b1, w2, b2, padding=1, neg_slope=0.2):
    def conv(v, w, b):
        y = jax.lax.conv_general_dilated(
            v, w, window_strides=(1, 1),
            padding=[(padding, padding), (padding, padding)],
            dimension_numbers=("NCHW", "OIHW", "NCHW"),
            precision=jax.lax.Precision.HIGHEST)
        return y + b.reshape(1, -1, 1, 1)

    def act(z):
        return jnp.where(z > 0, z, neg_slope * z)

    y = conv(act(conv(x, w1, b1)), w2, b2)
    return act(y + x)


if __name__ == "__main__":
    # Residual_Block(in_channels=8), activate='lrelu', at small NCHW shapes.
    # in_channels=8 with W=16 makes the lane-folded activation exactly 128 lanes.
    N, C, H, W = 2, 8, 16, 16
    KH = KW = 3

    key = jax.random.PRNGKey(0)
    kx, kw1, kb1, kw2, kb2 = jax.random.split(key, 5)
    x = jax.random.normal(kx, (N, C, H, W), dtype=jnp.float32)

    fan_in = C * KH * KW
    bound = 1.0 / float(fan_in) ** 0.5
    w1 = jax.random.uniform(kw1, (C, C, KH, KW), jnp.float32, -bound, bound)
    b1 = jax.random.uniform(kb1, (C,), jnp.float32, -bound, bound)
    w2 = jax.random.uniform(kw2, (C, C, KH, KW), jnp.float32, -bound, bound)
    b2 = jax.random.uniform(kb2, (C,), jnp.float32, -bound, bound)

    out = residual_block_pallas(x, w1, b1, w2, b2)
    out = jax.block_until_ready(out)

    ref = _reference(x, w1, b1, w2, b2)
    assert out.shape == (N, C, H, W)
    assert jnp.allclose(out, ref, atol=2e-4, rtol=2e-4), "mismatch vs reference"

    print("KERNEL_OK")
</pallas_src>

<mosaic_0001>
module attributes {stable_mosaic.version = 11 : i64} {
  func.func @_residual_block_kernel(%arg0: i32, %arg1: memref<2x16x128xf32, #tpu.memory_space<vmem>>, %arg2: memref<384x128xf32, #tpu.memory_space<vmem>>, %arg3: memref<1x128xf32, #tpu.memory_space<vmem>>, %arg4: memref<384x128xf32, #tpu.memory_space<vmem>>, %arg5: memref<1x128xf32, #tpu.memory_space<vmem>>, %arg6: memref<2x16x128xf32, #tpu.memory_space<vmem>>, %arg7: memref<2x32x128xf32, #tpu.memory_space<vmem>>) attributes {dimension_semantics = [#tpu.dimension_semantics<arbitrary>], iteration_bounds = array<i64: 1>, scalar_prefetch = 0 : i64, scratch_operands = 1 : i64, tpu.core_type = #tpu.core_type<tc>, window_params = [{pipeline_mode = #tpu.pipeline_mode<synchronous>, transform_indices = @transform_0, window_bounds = array<i64: 2, 16, 128>}, {pipeline_mode = #tpu.pipeline_mode<synchronous>, transform_indices = @transform_1, window_bounds = array<i64: 384, 128>}, {pipeline_mode = #tpu.pipeline_mode<synchronous>, transform_indices = @transform_2, window_bounds = array<i64: 1, 128>}, {pipeline_mode = #tpu.pipeline_mode<synchronous>, transform_indices = @transform_3, window_bounds = array<i64: 384, 128>}, {pipeline_mode = #tpu.pipeline_mode<synchronous>, transform_indices = @transform_4, window_bounds = array<i64: 1, 128>}, {pipeline_mode = #tpu.pipeline_mode<synchronous>, transform_indices = @transform_5, window_bounds = array<i64: 2, 16, 128>}]} {
    %cst = arith.constant 0.000000e+00 : f32
    %0 = vector.broadcast %cst : f32 to vector<2x32x128xf32>
    %c0 = arith.constant 0 : index
    %c0_0 = arith.constant 0 : index
    %c0_1 = arith.constant 0 : index
    %1 = vector.load %arg7[%c0, %c0_0, %c0_1] : memref<2x32x128xf32, #tpu.memory_space<vmem>>, vector<2x32x128xf32>
    tpu.vector_store %arg7[%c0, %c0_0, %c0_1], %0 {strides = array<i32>} : memref<2x32x128xf32, #tpu.memory_space<vmem>>, vector<2x32x128xf32>,
    %c0_2 = arith.constant 0 : index
    %c0_3 = arith.constant 0 : index
    %c0_4 = arith.constant 0 : index
    %2 = vector.load %arg1[%c0_2, %c0_3, %c0_4] : memref<2x16x128xf32, #tpu.memory_space<vmem>>, vector<2x16x128xf32>
    %c0_5 = arith.constant 0 : index
    %c8 = arith.constant 8 : index
    %c0_6 = arith.constant 0 : index
    %3 = vector.load %arg7[%c0_5, %c8, %c0_6] : memref<2x32x128xf32, #tpu.memory_space<vmem>>, vector<2x16x128xf32>
    tpu.vector_store %arg7[%c0_5, %c8, %c0_6], %2 {strides = array<i32>} : memref<2x32x128xf32, #tpu.memory_space<vmem>>, vector<2x16x128xf32>,
    %c0_7 = arith.constant 0 : index
    %c7 = arith.constant 7 : index
    %c0_8 = arith.constant 0 : index
    %4 = vector.load %arg7[%c0_7, %c7, %c0_8] : memref<2x32x128xf32, #tpu.memory_space<vmem>>, vector<2x16x128xf32>
    %5 = vector.shape_cast %4 : vector<2x16x128xf32> to vector<32x128xf32>
    %c0_9 = arith.constant 0 : index
    %c8_10 = arith.constant 8 : index
    %c0_11 = arith.constant 0 : index
    %6 = vector.load %arg7[%c0_9, %c8_10, %c0_11] : memref<2x32x128xf32, #tpu.memory_space<vmem>>, vector<2x16x128xf32>
    %7 = vector.shape_cast %6 : vector<2x16x128xf32> to vector<32x128xf32>
    %c0_12 = arith.constant 0 : index
    %c9 = arith.constant 9 : index
    %c0_13 = arith.constant 0 : index
    %8 = vector.load %arg7[%c0_12, %c9, %c0_13] : memref<2x32x128xf32, #tpu.memory_space<vmem>>, vector<2x16x128xf32>
    %9 = vector.shape_cast %8 : vector<2x16x128xf32> to vector<32x128xf32>
    %10 = tpu.concatenate %5, %7, %9 in 1 : vector<32x128xf32>, vector<32x128xf32>, vector<32x128xf32> -> vector<32x384xf32>
    %c0_14 = arith.constant 0 : index
    %c0_15 = arith.constant 0 : index
    %11 = vector.load %arg2[%c0_14, %c0_15] : memref<384x128xf32, #tpu.memory_space<vmem>>, vector<384x128xf32>
    %cst_16 = arith.constant dense<0.000000e+00> : vector<32x128xf32>
    %12 = tpu.matmul %10, %11, %cst_16 {dimension_numbers = #tpu.dot_dimension_numbers<[1], [0], [0], [1], [0, 0, 1, 1], [], []>} : vector<32x384xf32>, vector<384x128xf32>, vector<32x128xf32> -> vector<32x128xf32>
    %c0_17 = arith.constant 0 : index
    %c0_18 = arith.constant 0 : index
    %13 = vector.load %arg3[%c0_17, %c0_18] : memref<1x128xf32, #tpu.memory_space<vmem>>, vector<1x128xf32>
    %14 = vector.broadcast %13 : vector<1x128xf32> to vector<32x128xf32>
    %15 = arith.addf %12, %14 : vector<32x128xf32>
    %cst_19 = arith.constant 0.000000e+00 : f32
    %16 = vector.broadcast %cst_19 : f32 to vector<32x128xf32>
    %17 = arith.cmpf ogt, %15, %16 : vector<32x128xf32>
    %cst_20 = arith.constant 2.000000e-01 : f32
    %18 = vector.broadcast %cst_20 : f32 to vector<32x128xf32>
    %19 = arith.mulf %18, %15 : vector<32x128xf32>
    %20 = arith.select %17, %15, %19 : vector<32x128xi1>, vector<32x128xf32>
    %21 = vector.shape_cast %20 : vector<32x128xf32> to vector<2x16x128xf32>
    %c0_21 = arith.constant 0 : index
    %c8_22 = arith.constant 8 : index
    %c0_23 = arith.constant 0 : index
    %22 = vector.load %arg7[%c0_21, %c8_22, %c0_23] : memref<2x32x128xf32, #tpu.memory_space<vmem>>, vector<2x16x128xf32>
    tpu.vector_store %arg7[%c0_21, %c8_22, %c0_23], %21 {strides = array<i32>} : memref<2x32x128xf32, #tpu.memory_space<vmem>>, vector<2x16x128xf32>,
    %c0_24 = arith.constant 0 : index
    %c7_25 = arith.constant 7 : index
    %c0_26 = arith.constant 0 : index
    %23 = vector.load %arg7[%c0_24, %c7_25, %c0_26] : memref<2x32x128xf32, #tpu.memory_space<vmem>>, vector<2x16x128xf32>
    %24 = vector.shape_cast %23 : vector<2x16x128xf32> to vector<32x128xf32>
    %c0_27 = arith.constant 0 : index
    %c8_28 = arith.constant 8 : index
    %c0_29 = arith.constant 0 : index
    %25 = vector.load %arg7[%c0_27, %c8_28, %c0_29] : memref<2x32x128xf32, #tpu.memory_space<vmem>>, vector<2x16x128xf32>
    %26 = vector.shape_cast %25 : vector<2x16x128xf32> to vector<32x128xf32>
    %c0_30 = arith.constant 0 : index
    %c9_31 = arith.constant 9 : index
    %c0_32 = arith.constant 0 : index
    %27 = vector.load %arg7[%c0_30, %c9_31, %c0_32] : memref<2x32x128xf32, #tpu.memory_space<vmem>>, vector<2x16x128xf32>
    %28 = vector.shape_cast %27 : vector<2x16x128xf32> to vector<32x128xf32>
    %29 = tpu.concatenate %24, %26, %28 in 1 : vector<32x128xf32>, vector<32x128xf32>, vector<32x128xf32> -> vector<32x384xf32>
    %c0_33 = arith.constant 0 : index
    %c0_34 = arith.constant 0 : index
    %30 = vector.load %arg4[%c0_33, %c0_34] : memref<384x128xf32, #tpu.memory_space<vmem>>, vector<384x128xf32>
    %cst_35 = arith.constant dense<0.000000e+00> : vector<32x128xf32>
    %31 = tpu.matmul %29, %30, %cst_35 {dimension_numbers = #tpu.dot_dimension_numbers<[1], [0], [0], [1], [0, 0, 1, 1], [], []>} : vector<32x384xf32>, vector<384x128xf32>, vector<32x128xf32> -> vector<32x128xf32>
    %c0_36 = arith.constant 0 : index
    %c0_37 = arith.constant 0 : index
    %32 = vector.load %arg5[%c0_36, %c0_37] : memref<1x128xf32, #tpu.memory_space<vmem>>, vector<1x128xf32>
    %33 = vector.broadcast %32 : vector<1x128xf32> to vector<32x128xf32>
    %34 = arith.addf %31, %33 : vector<32x128xf32>
    %35 = vector.shape_cast %2 : vector<2x16x128xf32> to vector<32x128xf32>
    %36 = arith.addf %34, %35 : vector<32x128xf32>
    %cst_38 = arith.constant 0.000000e+00 : f32
    %37 = vector.broadcast %cst_38 : f32 to vector<32x128xf32>
    %38 = arith.cmpf ogt, %36, %37 : vector<32x128xf32>
    %cst_39 = arith.constant 2.000000e-01 : f32
    %39 = vector.broadcast %cst_39 : f32 to vector<32x128xf32>
    %40 = arith.mulf %39, %36 : vector<32x128xf32>
    %41 = arith.select %38, %36, %40 : vector<32x128xi1>, vector<32x128xf32>
    %42 = vector.shape_cast %41 : vector<32x128xf32> to vector<2x16x128xf32>
    %c0_40 = arith.constant 0 : index
    %c0_41 = arith.constant 0 : index
    %c0_42 = arith.constant 0 : index
    %43 = vector.load %arg6[%c0_40, %c0_41, %c0_42] : memref<2x16x128xf32, #tpu.memory_space<vmem>>, vector<2x16x128xf32>
    tpu.vector_store %arg6[%c0_40, %c0_41, %c0_42], %42 {strides = array<i32>} : memref<2x16x128xf32, #tpu.memory_space<vmem>>, vector<2x16x128xf32>,
    return
  }
  func.func @transform_0(%arg0: i32) -> (i32, i32, i32) {
    %c0_i32 = arith.constant 0 : i32
    %c0_i32_0 = arith.constant 0 : i32
    %c0_i32_1 = arith.constant 0 : i32
    %c0_i32_2 = arith.constant 0 : i32
    return %c0_i32, %c0_i32_0, %c0_i32_1 : i32, i32, i32
  }
  func.func @transform_1(%arg0: i32) -> (i32, i32) {
    %c0_i32 = arith.constant 0 : i32
    %c0_i32_0 = arith.constant 0 : i32
    %c0_i32_1 = arith.constant 0 : i32
    return %c0_i32, %c0_i32_0 : i32, i32
  }
  func.func @transform_2(%arg0: i32) -> (i32, i32) {
    %c0_i32 = arith.constant 0 : i32
    %c0_i32_0 = arith.constant 0 : i32
    %c0_i32_1 = arith.constant 0 : i32
    return %c0_i32, %c0_i32_0 : i32, i32
  }
  func.func @transform_3(%arg0: i32) -> (i32, i32) {
    %c0_i32 = arith.constant 0 : i32
    %c0_i32_0 = arith.constant 0 : i32
    %c0_i32_1 = arith.constant 0 : i32
    return %c0_i32, %c0_i32_0 : i32, i32
  }
  func.func @transform_4(%arg0: i32) -> (i32, i32) {
    %c0_i32 = arith.constant 0 : i32
    %c0_i32_0 = arith.constant 0 : i32
    %c0_i32_1 = arith.constant 0 : i32
    return %c0_i32, %c0_i32_0 : i32, i32
  }
  func.func @transform_5(%arg0: i32) -> (i32, i32, i32) {
    %c0_i32 = arith.constant 0 : i32
    %c0_i32_0 = arith.constant 0 : i32
    %c0_i32_1 = arith.constant 0 : i32
    %c0_i32_2 = arith.constant 0 : i32
    return %c0_i32, %c0_i32_0, %c0_i32_1 : i32, i32, i32
  }
}

</mosaic_0001>

<bundles_post_ra>
// kernel: tpu_custom_call.1
= control target key start
LH: loop header
LB: loop body
LE: loop exit
PB: predicated region body
PF: predicated region fallthrough
CT: control target
= control target key end

     0   :  { %10 = vsyncpa [#allocation4], 0  ;;  %s684_s0 = inlined_call_operand.hbm [shape: f32[2,16,128], index: 0, kind: input, shape index: {}]   ;;  %s685_s1 = inlined_call_operand.hbm [shape: f32[384,128], index: 1, kind: input, shape index: {}]   ;;  %s686_s2 = inlined_call_operand.vmem [shape: f32[1,128], index: 2, kind: input, shape index: {}]   ;;  %s687_s3 = inlined_call_operand.hbm [shape: f32[384,128], index: 3, kind: input, shape index: {}]   ;;  %s688_s4 = inlined_call_operand.vmem [shape: f32[1,128], index: 4, kind: input, shape index: {}]   ;;  %s689_s5 = inlined_call_operand.hbm [shape: f32[2,16,128], index: 5, kind: output, shape index: {}]  }
   0x1   :  { %11 = vsyncpa [#allocation7], 0 }
   0x2   :  { %12 = vsyncpa [#allocation5], 0  ;;  %s30_s20 = sshll.u32 %s685_s1, 4  ;;  %s585_s21 = smov [#allocation6]   ;;  %s31_s20 = int_to_ptr.hbm [resolvable:$true] %s30_s20 }
   0x3   :  { %s32_s22 = sshll.u32 %s585_s21, 4  ;;  %s17_s25 = sshll.u32 %s684_s0, 4  ;;  %s33_s22 = int_to_ptr.vmem [resolvable:$true] %s32_s22  ;;  %s18_s25 = int_to_ptr.hbm [resolvable:$true] %s17_s25 }
   0x4   :  { %s586_s26 = smov 128   ;;  %s587_s27 = smov 8  }
   0x5   :  { %38 = dma.hbm_to_vmem [thread:$0]  %s31_s20, 6144, %s33_s22, [#allocation7], %s586_s26, %s586_s26, %s587_s27  }
   0x6   :  { %s588_s28 = smov [#allocation3]   ;;  %s45_s1 = sshll.u32 %s687_s3, 4  ;;  %s46_s1 = int_to_ptr.hbm [resolvable:$true] %s45_s1 }
   0x7   :  { %s19_s29 = sshll.u32 %s588_s28, 4  ;;  %s589_s0 = smov [#allocation8]   ;;  %s20_s29 = int_to_ptr.vmem [resolvable:$true] %s19_s29 }
   0x8   :  { %25 = dma.hbm_to_vmem [thread:$0]  %s18_s25, 512, %s20_s29, [#allocation4], %s586_s26, %s586_s26, %s587_s27  }
   0x9   :  { %s47_s7 = sshll.u32 %s589_s0, 4  ;;  %s48_s7 = int_to_ptr.vmem [resolvable:$true] %s47_s7 }
   0xa   :  { %53 = dma.hbm_to_vmem [thread:$0]  %s46_s1, 6144, %s48_s7, [#allocation7], %s586_s26, %s586_s26, %s587_s27  }
   0xb   :  { %579 = dma.done.wait [#allocation4], 512  }
   0xc   :  { %580 = vsyncadd [#allocation4], 4294966784 }
   0xd   :  { %581 = dma.done.wait [#allocation7], 12288  }
   0xe   :  { %582 = vsyncadd [#allocation7], 4294955008  ;;  %v590_v0 = vmov 0.0   ;;  %v143_v1 = vld [vmem:[#allocation6 + $0x178] sm:$0xff]  ;;  %v142_v3 = vld [vmem:[#allocation6 + $0x170] sm:$0xff]  ;;  %s428_s13 = sshll.u32 %s689_s5, 4  ;;  %s429_s13 = int_to_ptr.hbm [resolvable:$true] %s428_s13 }
   0xf   :  { %68 = vst [vmem:[#allocation2] sm:$0xff] %v590_v0  ;;  %v111_v2 = vld [vmem:[#allocation6 + $0x78] sm:$0xff]  ;;  %206 = vmatpush.msra.mxu2 %v143_v1  ;;  %v110_v4 = vld [vmem:[#allocation6 + $0x70] sm:$0xff]  ;;  %v141_v6 = vld [vmem:[#allocation6 + $0x168] sm:$0xff] }
  0x10   :  { %71 = vst [vmem:[#allocation2 + $0x18] sm:$0xff] %v590_v0  ;;  %148 = vmatpush.msra.mxu0 %v111_v2  ;;  %v127_v5 = vld [vmem:[#allocation6 + $0xf8] sm:$0xff]  ;;  %v109_v7 = vld [vmem:[#allocation6 + $0x68] sm:$0xff]  ;;  %v126_v8 = vld [vmem:[#allocation6 + $0xf0] sm:$0xff] }
  0x11   :  { %72 = vst [vmem:[#allocation2 + $0x20] sm:$0xff] %v590_v0  ;;  %177 = vmatpush.msra.mxu1 %v127_v5  ;;  %207 = vmatpush.msra.mxu2 %v142_v3  ;;  %v125_v9 = vld [vmem:[#allocation6 + $0xe8] sm:$0xff]  ;;  %v140_v10 = vld [vmem:[#allocation6 + $0x160] sm:$0xff]  ;;  %v139_v13 = vld [vmem:[#allocation6 + $0x158] sm:$0xff] }
  0x12   :  { %75 = vst [vmem:[#allocation2 + $0x38] sm:$0xff] %v590_v0  ;;  %149 = vmatpush.msra.mxu0 %v110_v4  ;;  %v108_v11 = vld [vmem:[#allocation6 + $0x60] sm:$0xff]  ;;  %v107_v14 = vld [vmem:[#allocation6 + $0x58] sm:$0xff]  ;;  %v138_v16 = vld [vmem:[#allocation6 + $0x150] sm:$0xff] }
  0x13   :  { %178 = vmatpush.msra.mxu1 %v126_v8  ;;  %208 = vmatpush.msra.mxu2 %v141_v6  ;;  %v124_v12 = vld [vmem:[#allocation6 + $0xe0] sm:$0xff]  ;;  %v123_v15 = vld [vmem:[#allocation6 + $0xd8] sm:$0xff]  ;;  %v106_v17 = vld [vmem:[#allocation6 + $0x50] sm:$0xff] }
  0x14   :  { %150 = vmatpush.msra.mxu0 %v109_v7  ;;  %v122_v18 = vld [vmem:[#allocation6 + $0xd0] sm:$0xff]  ;;  %v137_v19 = vld [vmem:[#allocation6 + $0x148] sm:$0xff]  ;;  %v136_v22 = vld [vmem:[#allocation6 + $0x140] sm:$0xff] }
  0x15   :  { %179 = vmatpush.msra.mxu1 %v125_v9  ;;  %209 = vmatpush.msra.mxu2 %v140_v10  ;;  %v105_v20 = vld [vmem:[#allocation6 + $0x48] sm:$0xff]  ;;  %v104_v23 = vld [vmem:[#allocation6 + $0x40] sm:$0xff]  ;;  %v135_v25 = vld [vmem:[#allocation6 + $0x138] sm:$0xff] }
  0x16   :  { %151 = vmatpush.msra.mxu0 %v108_v11  ;;  %v121_v21 = vld [vmem:[#allocation6 + $0xc8] sm:$0xff]  ;;  %v120_v24 = vld [vmem:[#allocation6 + $0xc0] sm:$0xff]  ;;  %v103_v26 = vld [vmem:[#allocation6 + $0x38] sm:$0xff] }
  0x17   :  { %180 = vmatpush.msra.mxu1 %v124_v12  ;;  %210 = vmatpush.msra.mxu2 %v139_v13  ;;  %v134_v27 = vld [vmem:[#allocation6 + $0x130] sm:$0xff]  ;;  %v119_v28 = vld [vmem:[#allocation6 + $0xb8] sm:$0xff]  ;;  %v640_v29 = vld [vmem:[#allocation3] sm:$0xff] }
  0x18   :  { %152 = vmatpush.msra.mxu0 %v107_v14  ;;  %v642_v30 = vld [vmem:[#allocation3 + $0x8] sm:$0xff]  ;;  %v102_v31 = vld [vmem:[#allocation6 + $0x30] sm:$0xff]  ;;  %80 = vst [vmem:[#allocation2 + $0x8] sm:$0xff] %v640_v29  ;;  %v648_v34 = vld [vmem:[#allocation3 + $0x18] sm:$0xff] }
  0x19   :  { %181 = vmatpush.msra.mxu1 %v123_v15  ;;  %211 = vmatpush.msra.mxu2 %v138_v16  ;;  %v118_v32 = vld [vmem:[#allocation6 + $0xb0] sm:$0xff]  ;;  %81 = vst [vmem:[#allocation2 + $0x10] sm:$0xff] %v642_v30  ;;  %v133_v35 = vld [vmem:[#allocation6 + $0x128] sm:$0xff]  ;;  %v132_v38 = vld [vmem:[#allocation6 + $0x120] sm:$0xff] }
  0x1a   :  { %153 = vmatpush.msra.mxu0 %v106_v17  ;;  %v645_v33 = vld [vmem:[#allocation3 + $0x10] sm:$0xff]  ;;  %v101_v36 = vld [vmem:[#allocation6 + $0x28] sm:$0xff]  ;;  %83 = vst [vmem:[#allocation2 + $0x30] sm:$0xff] %v648_v34  ;;  %v100_v39 = vld [vmem:[#allocation6 + $0x20] sm:$0xff] }
  0x1b   :  { %182 = vmatpush.msra.mxu1 %v122_v18  ;;  %212 = vmatpush.msra.mxu2 %v137_v19  ;;  %82 = vst [vmem:[#allocation2 + $0x28] sm:$0xff] %v645_v33  ;;  %v117_v37 = vld [vmem:[#allocation6 + $0xa8] sm:$0xff]  ;;  %v116_v40 = vld [vmem:[#allocation6 + $0xa0] sm:$0xff]  ;;  %v131_v41 = vld [vmem:[#allocation6 + $0x118] sm:$0xff] }
  0x1c   :  { %154 = vmatpush.msra.mxu0 %v105_v20  ;;  %v99_v42 = vld [vmem:[#allocation6 + $0x18] sm:$0xff]  ;;  %v130_v44 = vld [vmem:[#allocation6 + $0x110] sm:$0xff]  ;;  %v129_v47 = vld [vmem:[#allocation6 + $0x108] sm:$0xff] }
  0x1d   :  { %183 = vmatpush.msra.mxu1 %v121_v21  ;;  %213 = vmatpush.msra.mxu2 %v136_v22  ;;  %v115_v43 = vld [vmem:[#allocation6 + $0x98] sm:$0xff]  ;;  %v98_v45 = vld [vmem:[#allocation6 + $0x10] sm:$0xff]  ;;  %v97_v48 = vld [vmem:[#allocation6 + $0x8] sm:$0xff] }
  0x1e   :  { %155 = vmatpush.msra.mxu0 %v104_v23  ;;  %v114_v46 = vld [vmem:[#allocation6 + $0x90] sm:$0xff]  ;;  %v113_v49 = vld [vmem:[#allocation6 + $0x88] sm:$0xff]  ;;  %v278_v50 = vld [vmem:[#allocation8 + $0x78] sm:$0xff] }
  0x1f   :  { %184 = vmatpush.msra.mxu1 %v120_v24  ;;  %214 = vmatpush.msra.mxu2 %v135_v25  ;;  %v277_v51 = vld [vmem:[#allocation8 + $0x70] sm:$0xff]  ;;  %v128_v52 = vld [vmem:[#allocation6 + $0x100] sm:$0xff]  ;;  %v294_v57 = vld [vmem:[#allocation8 + $0xf8] sm:$0xff] }
  0x20   :  { %156 = vmatpush.msra.mxu0 %v103_v26  ;;  %v96_v53 = vld [vmem:[#allocation6] sm:$0xff]  ;;  %315 = vmatpush.msra.mxu3 %v278_v50  ;;  %v92_v54 = vld [vmem:[#allocation2 + $0x9] sm:$0xff]  ;;  %v652_v60 = vld [vmem:[#allocation8 + $0x178] sm:$0xff] }
  0x21   :  { %185 = vmatpush.msra.mxu1 %v119_v28  ;;  %215 = vmatpush.msra.mxu2 %v134_v27  ;;  %v84_v55 = vld [vmem:[#allocation2 + $0x7] sm:$0xff]  ;;  %v293_v59 = vld [vmem:[#allocation8 + $0xf0] sm:$0xff]  ;;  %v274_v0 = vld [vmem:[#allocation8 + $0x58] sm:$0xff] }
  0x22   :  { %157 = vmatpush.msra.mxu0 %v102_v31  ;;  %v112_v56 = vld [vmem:[#allocation6 + $0x80] sm:$0xff]  ;;  %316 = vmatpush.msra.mxu3 %v277_v51  ;;  %v276_v58 = vld [vmem:[#allocation8 + $0x68] sm:$0xff]  ;;  %v655_v63 = vld [vmem:[#allocation8 + $0x170] sm:$0xff] }
  0x23   :  { %186 = vmatpush.msra.mxu1 %v118_v32  ;;  %216 = vmatpush.msra.mxu2 %v133_v35  ;;  %v275_v61 = vld [vmem:[#allocation8 + $0x60] sm:$0xff]  ;;  %v292_v62 = vld [vmem:[#allocation8 + $0xe8] sm:$0xff]  ;;  %v93_v3 = vld [vmem:[#allocation2 + $0x11] sm:$0xff] }
  0x24   :  { %158 = vmatpush.msra.mxu0 %v101_v36  ;;  %317 = vmatpush.msra.mxu3 %v276_v58  ;;  %v291_v1 = vld [vmem:[#allocation8 + $0xe0] sm:$0xff]  ;;  %v658_v2 = vld [vmem:[#allocation8 + $0x168] sm:$0xff]  ;;  %v290_v5 = vld [vmem:[#allocation8 + $0xd8] sm:$0xff] }
  0x25   :  { %187 = vmatpush.msra.mxu1 %v117_v37  ;;  %217 = vmatpush.msra.mxu2 %v132_v38  ;;  %v85_v4 = vld [vmem:[#allocation2 + $0xf] sm:$0xff]  ;;  %v86_v11 = vld [vmem:[#allocation2 + $0x27] sm:$0xff]  ;;  %v286_v15 = vld [vmem:[#allocation8 + $0xb8] sm:$0xff] }
  0x26   :  { %159 = vmatpush.msra.mxu0 %v100_v39  ;;  %318 = vmatpush.msra.mxu3 %v275_v61  ;;  %v273_v6 = vld [vmem:[#allocation8 + $0x50] sm:$0xff]  ;;  %v272_v8 = vld [vmem:[#allocation8 + $0x48] sm:$0xff]  ;;  %v287_v14 = vld [vmem:[#allocation8 + $0xc0] sm:$0xff] }
  0x27   :  { %188 = vmatpush.msra.mxu1 %v116_v40  ;;  %218 = vmatpush.msra.mxu2 %v131_v41  ;;  %v289_v7 = vld [vmem:[#allocation8 + $0xd0] sm:$0xff]  ;;  %v288_v9 = vld [vmem:[#allocation8 + $0xc8] sm:$0xff]  ;;  %v271_v18 = vld [vmem:[#allocation8 + $0x40] sm:$0xff] }
  0x28   :  { %160 = vmatpush.msra.mxu0 %v99_v42  ;;  %319 = vmatpush.msra.mxu3 %v274_v0  ;;  %v94_v10 = vld [vmem:[#allocation2 + $0x29] sm:$0xff]  ;;  %v95_v12 = vld [vmem:[#allocation2 + $0x31] sm:$0xff]  ;;  %v307_v19 = vld [vmem:[#allocation8 + $0x160] sm:$0xff] }
  0x29   :  { %189 = vmatpush.msra.mxu1 %v115_v43  ;;  %219 = vmatpush.msra.mxu2 %v130_v44  ;;  %v87_v13 = vld [vmem:[#allocation2 + $0x2f] sm:$0xff]  ;;  %v283_v20 = vld [vmem:[#allocation8 + $0xa0] sm:$0xff]  ;;  %v270_v21 = vld [vmem:[#allocation8 + $0x38] sm:$0xff] }
  0x2a   :  { %161 = vmatpush.msra.mxu0 %v98_v45  ;;  %320 = vmatpush.msra.mxu3 %v273_v6  ;;  %v285_v16 = vld [vmem:[#allocation8 + $0xb0] sm:$0xff]  ;;  %v284_v17 = vld [vmem:[#allocation8 + $0xa8] sm:$0xff]  ;;  %v306_v22 = vld [vmem:[#allocation8 + $0x158] sm:$0xff] }
  0x2b   :  { %190 = vmatpush.msra.mxu1 %v114_v46  ;;  %220 = vmatpush.msra.mxu2 %v129_v47  ;;  %v282_v23 = vld [vmem:[#allocation8 + $0x98] sm:$0xff]  ;;  %v269_v24 = vld [vmem:[#allocation8 + $0x30] sm:$0xff]  ;;  %v268_v27 = vld [vmem:[#allocation8 + $0x28] sm:$0xff] }
  0x2c   :  { %162 = vmatpush.msra.mxu0 %v97_v48  ;;  %321 = vmatpush.msra.mxu3 %v272_v8  ;;  %v305_v25 = vld [vmem:[#allocation8 + $0x150] sm:$0xff]  ;;  %v304_v28 = vld [vmem:[#allocation8 + $0x148] sm:$0xff]  ;;  %v267_v32 = vld [vmem:[#allocation8 + $0x20] sm:$0xff] }
  0x2d   :  { %191 = vmatpush.msra.mxu1 %v113_v49  ;;  %221 = vmatpush.msra.mxu2 %v128_v52  ;;  %v281_v26 = vld [vmem:[#allocation8 + $0x90] sm:$0xff]  ;;  %v280_v31 = vld [vmem:[#allocation8 + $0x88] sm:$0xff]  ;;  %v303_v35 = vld [vmem:[#allocation8 + $0x140] sm:$0xff] }
  0x2e   :  { %163 = vmatpush.msra.mxu0 %v96_v53  ;;  %222 = vmatmul.f32.vlgmr.msra.gmra.mxu2 %v92_v54  ;;  %v279_v36 = vld [vmem:[#allocation8 + $0x80] sm:$0xff]  ;;  %v266_v37 = vld [vmem:[#allocation8 + $0x18] sm:$0xff]  ;;  %v265_v39 = vld [vmem:[#allocation8 + $0x10] sm:$0xff] }
  0x2f   :  { %164 = vmatmul.f32.vlgmr.msra.gmra.mxu0 %v84_v55  ;;  %192 = vmatpush.msra.mxu1 %v112_v56  ;;  %v302_v38 = vld [vmem:[#allocation8 + $0x138] sm:$0xff]  ;;  %v301_v40 = vld [vmem:[#allocation8 + $0x130] sm:$0xff]  ;;  %v264_v41 = vld [vmem:[#allocation8 + $0x8] sm:$0xff] }
  0x30   :  { %344 = vmatpush.msrb.mxu0 %v294_v57  ;;  %193 = vmatmul.f32.vlgmr.msra.gmra.mxu1 %v640_v29  ;;  %v300_v42 = vld [vmem:[#allocation8 + $0x128] sm:$0xff]  ;;  %v263_v43 = vld [vmem:[#allocation8] sm:$0xff]  ;;  %v298_v45 = vld [vmem:[#allocation8 + $0x118] sm:$0xff] }
  0x31   :  { %373 = vmatpush.msrb.mxu1 %v652_v60  ;;  %442 = vmatpush.msrb.mxu2 %v294_v57  ;;  %v299_v44 = vld [vmem:[#allocation8 + $0x120] sm:$0xff]  ;;  %v297_v46 = vld [vmem:[#allocation8 + $0x110] sm:$0xff]  ;;  %v296_v47 = vld [vmem:[#allocation8 + $0x108] sm:$0xff] }
  0x32   :  { %345 = vmatpush.msrb.mxu0 %v293_v59  ;;  %322 = vmatpush.msra.mxu3 %v271_v18  ;;  %v295_v48 = vld [vmem:[#allocation8 + $0x100] sm:$0xff] }
  0x33   :  { %374 = vmatpush.msrb.mxu1 %v655_v63  ;;  %443 = vmatpush.msrb.mxu2 %v293_v59  ;;  %v481_v49 = vld [vmem:[%s686_s2] ss:$0 sm:$0xff] }
  0x34   :  { %346 = vmatpush.msrb.mxu0 %v292_v62  ;;  %323 = vmatpush.msra.mxu3 %v270_v21 }
  0x35   :  { %375 = vmatpush.msrb.mxu1 %v658_v2  ;;  %444 = vmatpush.msrb.mxu2 %v292_v62 }
  0x36   :  { %347 = vmatpush.msrb.mxu0 %v291_v1  ;;  %225 = vmatmul.f32.gmra.mxu2 %v93_v3 }
  0x37   :  { %167 = vmatmul.f32.gmra.mxu0 %v85_v4  ;;  %445 = vmatpush.msrb.mxu2 %v291_v1 }
  0x38   :  { %348 = vmatpush.msrb.mxu0 %v290_v5  ;;  %196 = vmatmul.f32.gmra.mxu1 %v642_v30 }
  0x39   :  { %446 = vmatpush.msrb.mxu2 %v290_v5  ;;  %376 = vmatpush.msrb.mxu1 %v307_v19 }
  0x3a   :  { %349 = vmatpush.msrb.mxu0 %v289_v7  ;;  %324 = vmatpush.msra.mxu3 %v269_v24 }
  0x3b   :  { %447 = vmatpush.msrb.mxu2 %v289_v7  ;;  %377 = vmatpush.msrb.mxu1 %v306_v22 }
  0x3c   :  { %350 = vmatpush.msrb.mxu0 %v288_v9  ;;  %325 = vmatpush.msra.mxu3 %v268_v27 }
  0x3d   :  { %448 = vmatpush.msrb.mxu2 %v288_v9  ;;  %378 = vmatpush.msrb.mxu1 %v305_v25 }
  0x3e   :  { %228 = vmatmul.f32.gmra.mxu2 %v94_v10  ;;  %351 = vmatpush.msrb.mxu0 %v287_v14 }
  0x3f   :  { %170 = vmatmul.f32.gmra.mxu0 %v86_v11  ;;  %449 = vmatpush.msrb.mxu2 %v287_v14 }
  0x40   :  { %199 = vmatmul.f32.gmra.mxu1 %v645_v33  ;;  %352 = vmatpush.msrb.mxu0 %v286_v15 }
  0x41   :  { %450 = vmatpush.msrb.mxu2 %v286_v15  ;;  %379 = vmatpush.msrb.mxu1 %v304_v28 }
  0x42   :  { %353 = vmatpush.msrb.mxu0 %v285_v16  ;;  %326 = vmatpush.msra.mxu3 %v267_v32 }
  0x43   :  { %451 = vmatpush.msrb.mxu2 %v285_v16  ;;  %380 = vmatpush.msrb.mxu1 %v303_v35 }
  0x44   :  { %354 = vmatpush.msrb.mxu0 %v284_v17  ;;  %327 = vmatpush.msra.mxu3 %v266_v37 }
  0x45   :  { %452 = vmatpush.msrb.mxu2 %v284_v17  ;;  %381 = vmatpush.msrb.mxu1 %v302_v38 }
  0x46   :  { %231 = vmatmul.f32.gmra.mxu2 %v95_v12  ;;  %355 = vmatpush.msrb.mxu0 %v283_v20 }
  0x47   :  { %173 = vmatmul.f32.gmra.mxu0 %v87_v13  ;;  %453 = vmatpush.msrb.mxu2 %v283_v20 }
  0x48   :  { %202 = vmatmul.f32.gmra.mxu1 %v648_v34  ;;  %356 = vmatpush.msrb.mxu0 %v282_v23 }
  0x49   :  { %454 = vmatpush.msrb.mxu2 %v282_v23  ;;  %328 = vmatpush.msra.mxu3 %v265_v39 }
  0x4a   :  { %357 = vmatpush.msrb.mxu0 %v281_v26  ;;  %382 = vmatpush.msrb.mxu1 %v301_v40 }
  0x4b   :  { %455 = vmatpush.msrb.mxu2 %v281_v26  ;;  %329 = vmatpush.msra.mxu3 %v264_v41  ;;  %v482_v26 = vld [vmem:[%s688_s4] ss:$0 sm:$0xff]  ;;  %s591_s4 = smov [#allocation9]  }
  0x4c   :  { %358 = vmatpush.msrb.mxu0 %v280_v31  ;;  %383 = vmatpush.msrb.mxu1 %v300_v42  ;;  %s426_s10 = sshll.u32 %s591_s4, 4  ;;  %s427_s10 = int_to_ptr.vmem [resolvable:$true] %s426_s10 }
  0x4d   :  { %456 = vmatpush.msrb.mxu2 %v280_v31  ;;  %330 = vmatpush.msra.mxu3 %v263_v43 }
  0x4e   :  { %359 = vmatpush.msrb.mxu0 %v279_v36  ;;  %384 = vmatpush.msrb.mxu1 %v299_v44 }
  0x4f   :  { %457 = vmatpush.msrb.mxu2 %v279_v36  ;;  %458 = vmatpush.msrb.mxu3 %v652_v60 }
  0x50   :  { %385 = vmatpush.msrb.mxu1 %v298_v45 }
  0x51   :  { %459 = vmatpush.msrb.mxu3 %v655_v63 }
  0x52   :  { %386 = vmatpush.msrb.mxu1 %v297_v46 }
  0x53   :  { %460 = vmatpush.msrb.mxu3 %v658_v2 }
  0x54   :  { %387 = vmatpush.msrb.mxu1 %v296_v47 }
  0x55   :  { %461 = vmatpush.msrb.mxu3 %v307_v19 }
  0x56   :  { %388 = vmatpush.msrb.mxu1 %v295_v48 }
  0x57   :  { %462 = vmatpush.msrb.mxu3 %v306_v22 }
  0x59   :  { %463 = vmatpush.msrb.mxu3 %v305_v25 }
  0x5b   :  { %464 = vmatpush.msrb.mxu3 %v304_v28 }
  0x5d   :  { %465 = vmatpush.msrb.mxu3 %v303_v35 }
  0x5f   :  { %466 = vmatpush.msrb.mxu3 %v302_v38 }
  0x61   :  { %467 = vmatpush.msrb.mxu3 %v301_v40 }
  0x63   :  { %468 = vmatpush.msrb.mxu3 %v300_v42 }
  0x65   :  { %469 = vmatpush.msrb.mxu3 %v299_v44 }
  0x67   :  { %470 = vmatpush.msrb.mxu3 %v298_v45 }
  0x69   :  { %471 = vmatpush.msrb.mxu3 %v297_v46 }
  0x6b   :  { %472 = vmatpush.msrb.mxu3 %v296_v47 }
  0x6d   :  { %473 = vmatpush.msrb.mxu3 %v295_v48 }
  0xac   :  { %v165_v50 = vpop.f32.mrf.mxu0 }
  0xad   :  { %v166_v51 = vadd.f32 %v481_v49, %v165_v50  ;;  %v194_v52 = vpop.f32.mrf.mxu1 }
  0xaf   :  { %v195_v53 = vadd.f32 %v194_v52, %v166_v51 }
  0xb1   :  { %v223_v54 = vpop.f32.mrf.mxu2 }
  0xb2   :  { %v224_v55 = vadd.f32 %v223_v54, %v195_v53 }
  0xb4   :  { %v168_v56 = vpop.f32.mrf.mxu0  ;;  %vm235_vm0 = vcmp.gt.f32.partialorder %v224_v55, 0.0  ;;  %v239_v57 = vmul.f32 0.2, %v224_v55 }
  0xb5   :  { %v169_v58 = vadd.f32 %v481_v49, %v168_v56  ;;  %v197_v59 = vpop.f32.mrf.mxu1 }
  0xb6   :  { %v243_v60 = vsel %vm235_vm0, %v224_v55, %v239_v57 }
  0xb7   :  { %v198_v61 = vadd.f32 %v197_v59, %v169_v58  ;;  %247 = vst [vmem:[#allocation2 + $0x8] sm:$0xff] %v243_v60  ;;  %360 = vmatmul.f32.vlgmr.msrb.gmra.mxu0 %v243_v60 }
  0xb9   :  { %v226_v62 = vpop.f32.mrf.mxu2 }
  0xba   :  { %v227_v63 = vadd.f32 %v226_v62, %v198_v61 }
  0xbc   :  { %v171_v0 = vpop.f32.mrf.mxu0  ;;  %vm236_vm1 = vcmp.gt.f32.partialorder %v227_v63, 0.0  ;;  %v240_v1 = vmul.f32 0.2, %v227_v63 }
  0xbd   :  { %v172_v2 = vadd.f32 %v481_v49, %v171_v0  ;;  %v200_v3 = vpop.f32.mrf.mxu1 }
  0xbe   :  { %v244_v4 = vsel %vm236_vm1, %v227_v63, %v240_v1  ;;  %v251_v6 = vld [vmem:[#allocation2 + $0x7] sm:$0xff] }
  0xbf   :  { %v201_v5 = vadd.f32 %v200_v3, %v172_v2  ;;  %248 = vst [vmem:[#allocation2 + $0x10] sm:$0xff] %v244_v4  ;;  %331 = vmatmul.f32.vlgmr.msra.gmra.mxu3 %v251_v6  ;;  %363 = vmatmul.f32.gmra.mxu0 %v244_v4 }
  0xc1   :  { %v229_v7 = vpop.f32.mrf.mxu2 }
  0xc2   :  { %v230_v8 = vadd.f32 %v229_v7, %v201_v5 }
  0xc4   :  { %v174_v9 = vpop.f32.mrf.mxu0  ;;  %vm237_vm2 = vcmp.gt.f32.partialorder %v230_v8, 0.0  ;;  %v241_v10 = vmul.f32 0.2, %v230_v8 }
  0xc5   :  { %v175_v11 = vadd.f32 %v481_v49, %v174_v9  ;;  %v203_v12 = vpop.f32.mrf.mxu1 }
  0xc6   :  { %v245_v13 = vsel %vm237_vm2, %v230_v8, %v241_v10  ;;  %v252_v15 = vld [vmem:[#allocation2 + $0xf] sm:$0xff] }
  0xc7   :  { %v204_v14 = vadd.f32 %v203_v12, %v175_v11  ;;  %v259_v16 = vld [vmem:[#allocation2 + $0x9] sm:$0xff]  ;;  %249 = vst [vmem:[#allocation2 + $0x28] sm:$0xff] %v245_v13  ;;  %334 = vmatmul.f32.gmra.mxu3 %v252_v15  ;;  %366 = vmatmul.f32.vlgmr.msrb.gmra.mxu2 %v245_v13  ;;  %v260_v22 = vld [vmem:[#allocation2 + $0x11] sm:$0xff] }
  0xc8   :  { %389 = vmatmul.f32.vlgmr.msrb.gmra.mxu1 %v259_v16 }
  0xc9   :  { %v232_v17 = vpop.f32.mrf.mxu2 }
  0xca   :  { %v233_v18 = vadd.f32 %v232_v17, %v204_v14 }
  0xcc   :  { %vm238_vm3 = vcmp.gt.f32.partialorder %v233_v18, 0.0  ;;  %v242_v19 = vmul.f32 0.2, %v233_v18 }
  0xce   :  { %v246_v20 = vsel %vm238_vm3, %v233_v18, %v242_v19  ;;  %v253_v21 = vld [vmem:[#allocation2 + $0x27] sm:$0xff] }
  0xcf   :  { %250 = vst [vmem:[#allocation2 + $0x30] sm:$0xff] %v246_v20  ;;  %337 = vmatmul.f32.gmra.mxu3 %v253_v21  ;;  %369 = vmatmul.f32.gmra.mxu2 %v246_v20 }
  0xd0   :  { %392 = vmatmul.f32.gmra.mxu1 %v260_v22 }
  0xd6   :  { %v254_v23 = vld [vmem:[#allocation2 + $0x2f] sm:$0xff] }
  0xd7   :  { %340 = vmatmul.f32.gmra.mxu3 %v254_v23  ;;  %v261_v24 = vld [vmem:[#allocation2 + $0x29] sm:$0xff]  ;;  %v262_v25 = vld [vmem:[#allocation2 + $0x31] sm:$0xff] }
  0xdf   :  { %395 = vmatmul.f32.vlgmr.msrb.gmra.mxu3 %v261_v24 }
  0xe7   :  { %398 = vmatmul.f32.gmra.mxu3 %v262_v25 }
 0x134   :  { %v361_v27 = vpop.f32.mrf.mxu0 }
 0x13c   :  { %v364_v41 = vpop.f32.mrf.mxu0 }
 0x142   :  { %v332_v28 = vpop.f32.mrf.mxu3 }
 0x143   :  { %v333_v31 = vadd.f32 %v482_v26, %v332_v28 }
 0x145   :  { %v390_v32 = vpop.f32.mrf.mxu1  ;;  %v362_v35 = vadd.f32 %v361_v27, %v333_v31 }
 0x147   :  { %v391_v36 = vadd.f32 %v390_v32, %v362_v35 }
 0x149   :  { %v402_v37 = vadd.f32 %v391_v36, %v640_v29 }
 0x14a   :  { %v335_v38 = vpop.f32.mrf.mxu3  ;;  %v367_v29 = vpop.f32.mrf.mxu2 }
 0x14b   :  { %vm406_vm4 = vcmp.gt.f32.partialorder %v402_v37, 0.0  ;;  %v410_v39 = vmul.f32 0.2, %v402_v37  ;;  %v336_v40 = vadd.f32 %v482_v26, %v335_v38 }
 0x14d   :  { %v414_v42 = vsel %vm406_vm4, %v402_v37, %v410_v39  ;;  %v365_v43 = vadd.f32 %v364_v41, %v336_v40  ;;  %v393_v44 = vpop.f32.mrf.mxu1 }
 0x14e   :  { %418 = vst [vmem:[#allocation9] sm:$0xff] %v414_v42 }
 0x14f   :  { %v394_v45 = vadd.f32 %v393_v44, %v365_v43 }
 0x151   :  { %v403_v46 = vadd.f32 %v394_v45, %v642_v30 }
 0x152   :  { %v338_v47 = vpop.f32.mrf.mxu3  ;;  %v370_v58 = vpop.f32.mrf.mxu2 }
 0x153   :  { %vm407_vm5 = vcmp.gt.f32.partialorder %v403_v46, 0.0  ;;  %v411_v48 = vmul.f32 0.2, %v403_v46  ;;  %v339_v51 = vadd.f32 %v482_v26, %v338_v47 }
 0x155   :  { %v415_v49 = vsel %vm407_vm5, %v403_v46, %v411_v48  ;;  %v368_v52 = vadd.f32 %v367_v29, %v339_v51 }
 0x156   :  { %419 = vst [vmem:[#allocation9 + $0x8] sm:$0xff] %v415_v49 }
 0x15a   :  { %v341_v50 = vpop.f32.mrf.mxu3 }
 0x15b   :  { %v342_v55 = vadd.f32 %v482_v26, %v341_v50 }
 0x15d   :  { %v371_v59 = vadd.f32 %v370_v58, %v342_v55 }
 0x162   :  { %v396_v53 = vpop.f32.mrf.mxu3 }
 0x163   :  { %v397_v54 = vadd.f32 %v396_v53, %v368_v52 }
 0x165   :  { %v404_v56 = vadd.f32 %v397_v54, %v645_v33 }
 0x167   :  { %vm408_vm6 = vcmp.gt.f32.partialorder %v404_v56, 0.0  ;;  %v412_v57 = vmul.f32 0.2, %v404_v56 }
 0x169   :  { %v416_v60 = vsel %vm408_vm6, %v404_v56, %v412_v57 }
 0x16a   :  { %420 = vst [vmem:[#allocation9 + $0x10] sm:$0xff] %v416_v60  ;;  %v399_v30 = vpop.f32.mrf.mxu3 }
 0x16b   :  { %v400_v61 = vadd.f32 %v399_v30, %v371_v59 }
 0x16d   :  { %v405_v62 = vadd.f32 %v400_v61, %v648_v34 }
 0x16f   :  { %vm409_vm7 = vcmp.gt.f32.partialorder %v405_v62, 0.0  ;;  %v413_v63 = vmul.f32 0.2, %v405_v62 }
 0x171   :  { %v417_v33 = vsel %vm409_vm7, %v405_v62, %v413_v63 }
 0x172   :  { %421 = vst [vmem:[#allocation9 + $0x18] sm:$0xff] %v417_v33 }
 0x173   :  { %434 = dma.vmem_to_hbm [thread:$0]  %s427_s10, 512, %s429_s13, [#allocation5], %s586_s26, %s586_s26, %s587_s27  }
 0x174   :  { %583 = dma.done.wait [#allocation5], 512  }
 0x175   :  { %584 = vsyncadd [#allocation5], 4294966784 }
 0x176   :  { %439 = vsyncpa [#allocation4], 1 }
 0x177   :  { %440 = vsyncpa [#allocation7], 1 }
 0x178   :  { %441 = vsyncpa [#allocation5], 1 }

</bundles_post_ra>
